<compile_context>
chip_gen: v5e
topology: v5e:2x2
jax: 0.10.0
libtpu: 0.0.40
codegen_flags: <defaults>
</compile_context>

<pallas_src>
import functools

import jax
import jax.numpy as jnp
from jax.experimental import pallas as pl
from jax.experimental.pallas import tpu as pltpu


def _round_up(x, m):
    return (x + m - 1) // m * m


def _cdiv(a, b):
    return (a + b - 1) // b


# ----------------------------- Pallas kernel ------------------------------- #
def _cnn_maxpool_relu_kernel(x_ref, w_ref, b_ref, o_ref, xcol_ref, *,
                             window, pad_h, seq_len, feat, hout, hout_p,
                             h_chunk):
    """
    x_ref   : (bt, S, F)               un-padded embedding block
    w_ref   : (window*F, c_pad)        im2col conv weight
    b_ref   : (1, c_pad)               conv bias (zero-padded to c_pad)
    o_ref   : (bt, c_pad)              relu(max_over_seq(conv(x)))
    xcol_ref: (bt, hout_p, window*F)   VMEM im2col scratch
    """
    bt = x_ref.shape[0]
    k_dim = w_ref.shape[0]
    c_pad = w_ref.shape[1]
    dt = x_ref.dtype

    # ---- build the im2col matrix in VMEM ----------------------------------
    # Column block k of output row h holds padded_x[h + k].  All slice bounds
    # are static.  Only the (tiny) conv zero-padding sub-rows are re-written
    # every step, so nothing depends on scratch contents surviving across
    # grid steps / TensorCores.  Sublane-alignment rows [hout, hout_p) are
    # left untouched: their matmul outputs are sliced away before the max.
    for k in range(window):
        cols = slice(k * feat, (k + 1) * feat)
        dst_lo = max(0, pad_h - k)
        dst_hi = min(hout, seq_len + pad_h - k)
        if dst_lo > 0:                      # conv zero-padding rows (top)
            xcol_ref[:, 0:dst_lo, cols] = jnp.zeros((bt, dst_lo, feat), dt)
        if dst_hi < hout:                   # conv zero-padding rows (bottom)
            xcol_ref[:, dst_hi:hout, cols] = jnp.zeros(
                (bt, hout - dst_hi, feat), dt)
        if dst_hi > dst_lo:
            src_lo = dst_lo + k - pad_h
            src_hi = dst_hi + k - pad_h
            xcol_ref[:, dst_lo:dst_hi, cols] = x_ref[:, src_lo:src_hi, :]

    # ---- conv as ONE K=window*F MXU matmul per Hout chunk + running max ----
    wv = w_ref[...]
    running = None
    for c0 in range(0, hout_p, h_chunk):    # static, few iterations
        rows = min(h_chunk, hout_p - c0)    # multiple of 8
        valid = min(rows, hout - c0)        # rows that really exist
        if valid <= 0:
            break
        lhs = xcol_ref[:, c0:c0 + rows, :].reshape(bt * rows, k_dim)
        acc = jnp.dot(lhs, wv, preferred_element_type=jnp.float32)
        acc3 = acc.reshape(bt, rows, c_pad)
        if valid < rows:                    # drop alignment-only rows
            acc3 = acc3[:, :valid, :]
        cmax = jnp.max(acc3, axis=1)        # (bt, c_pad), XLU reduce
        running = cmax if running is None else jnp.maximum(running, cmax)

    # bias is constant along the pooled axis -> add once, after the max.
    pooled = running + b_ref[...]
    o_ref[...] = jnp.maximum(pooled, 0.0).astype(o_ref.dtype)


# ------------------------------ JAX wrapper -------------------------------- #
def cnn_forward(embedding, conv_weight, conv_bias, *, window_size, pad_h=1,
                b_tile=None, h_chunk=None, compute_dtype=jnp.float32,
                vmem_budget_bytes=40 * 1024 * 1024):
    """
    embedding  : (B, S, F)                  activations
    conv_weight: (C, 1, window_size, F)     PyTorch Conv2d layout
    conv_bias  : (C,)
    returns    : (B, C) = relu(max_seq(conv2d(embedding, padding=(pad_h, 0))))
    """
    B, S, F = embedding.shape
    C = conv_weight.shape[0]
    assert conv_weight.shape == (C, 1, window_size, F)

    hout = S + 2 * pad_h - window_size + 1      # conv output length (stride 1)
    assert hout >= 1, "sequence too short for this window / padding"
    hout_p = _round_up(hout, 8)                 # sublane-aligned Hout
    k_dim = window_size * F                     # im2col contraction depth
    c_pad = _round_up(max(C, 128), 128)         # lane-dense channel dim

    x = embedding.astype(compute_dtype)
    # Weight: (C, 1, win, F) -> (win, F, C) -> (win*F, C), channels padded.
    w = jnp.transpose(conv_weight[:, 0, :, :], (1, 2, 0)).reshape(k_dim, C)
    w = jnp.pad(w.astype(compute_dtype), ((0, 0), (0, c_pad - C)))
    b2d = jnp.pad(conv_bias.reshape(1, C).astype(jnp.float32),
                  ((0, 0), (0, c_pad - C)))

    itemsize = jnp.dtype(compute_dtype).itemsize

    def footprint(bt):
        return (2 * bt * S * F * itemsize           # double-buffered input
                + bt * hout_p * k_dim * itemsize    # im2col scratch
                + 3 * bt * c_pad * 4)               # buffered output + pooled

    if b_tile is None:
        if B <= 8:
            b_tile = B
        else:
            b_tile = min(128, _round_up(B, 8))
            while b_tile > 8 and footprint(b_tile) > vmem_budget_bytes:
                b_tile -= 8
            # >= 2 grid steps: lets v7x use both TensorCores and lets the
            # BlockSpec pipeline overlap the input DMA with compute.
            b_tile = max(8, min(b_tile, _round_up(_cdiv(B, 2), 8)))
    else:
        # user-supplied tile must respect the (8,128) sublane constraint
        b_tile = B if b_tile >= B else _round_up(b_tile, 8)

    if h_chunk is None:
        # cap the per-chunk pre-pool activation (bt*h_chunk*c_pad f32) ~1 MiB
        cap = max(8, (1 << 20) // max(1, b_tile * c_pad * 4))
        h_chunk = min(hout_p, _round_up(min(cap, 128), 8))
    h_chunk = max(8, min(_round_up(h_chunk, 8), hout_p))

    grid = (_cdiv(B, b_tile),)
    vmem_limit = int(min(56 * 2 ** 20,
                         max(32 * 2 ** 20, footprint(b_tile) + 4 * 2 ** 20)))

    kernel = functools.partial(
        _cnn_maxpool_relu_kernel,
        window=window_size, pad_h=pad_h, seq_len=S, feat=F,
        hout=hout, hout_p=hout_p, h_chunk=h_chunk)

    out = pl.pallas_call(
        kernel,
        out_shape=jax.ShapeDtypeStruct((B, c_pad), jnp.float32),
        grid=grid,
        in_specs=[
            pl.BlockSpec((b_tile, S, F), lambda b: (b, 0, 0)),
            pl.BlockSpec((k_dim, c_pad), lambda b: (0, 0)),
            pl.BlockSpec((1, c_pad), lambda b: (0, 0)),
        ],
        out_specs=pl.BlockSpec((b_tile, c_pad), lambda b: (b, 0)),
        scratch_shapes=[pltpu.VMEM((b_tile, hout_p, k_dim), compute_dtype)],
        compiler_params=pltpu.CompilerParams(
            dimension_semantics=("parallel",),
            vmem_limit_bytes=vmem_limit,
        ),
    )(x, w, b2d)

    return out[:, :C]


# ------------------------- pure-JAX reference ------------------------------ #
def ref_forward(embedding, conv_weight, conv_bias, *, window_size, pad_h=1):
    xp = jnp.pad(embedding, ((0, 0), (pad_h, pad_h), (0, 0)))
    B, Hp, F = xp.shape
    hout = Hp - window_size + 1
    cols = jnp.stack([xp[:, k:k + hout, :] for k in range(window_size)], axis=2)
    conv = jnp.einsum("bhkw,ckw->bch", cols, conv_weight[:, 0]) \
        + conv_bias[None, :, None]
    pooled = jnp.max(conv, axis=2)                       # (B, C)
    return jnp.maximum(pooled, 0.0)


# --------------------------------- main ------------------------------------ #
if __name__ == "__main__":
    # hyperparameters consistent with the module (opt.*)
    batch = 2
    sent_max_length = 16          # in_height (sequence length)
    word_dim = 24
    pos_dim = 4
    in_width = word_dim + 2 * pos_dim     # 32
    hidden_size = 32              # out_channels
    window_size = 3

    key = jax.random.PRNGKey(0)
    k_emb, k_w, k_b = jax.random.split(key, 3)

    embedding = jax.random.normal(
        k_emb, (batch, sent_max_length, in_width), dtype=jnp.float32)
    conv_weight = 0.1 * jax.random.normal(
        k_w, (hidden_size, 1, window_size, in_width), dtype=jnp.float32)
    conv_bias = 0.1 * jax.random.normal(k_b, (hidden_size,), dtype=jnp.float32)

    out = cnn_forward(embedding, conv_weight, conv_bias, window_size=window_size)
    out = jax.block_until_ready(out)

    ref = ref_forward(embedding, conv_weight, conv_bias, window_size=window_size)
    assert out.shape == (batch, hidden_size)
    assert jnp.allclose(out, ref, atol=1e-4, rtol=1e-4), "mismatch vs reference"

    print("KERNEL_OK")
</pallas_src>

<mosaic_0001>
module attributes {stable_mosaic.version = 11 : i64} {
  func.func @_cnn_maxpool_relu_kernel(%arg0: i32, %arg1: memref<2x16x32xf32, #tpu.memory_space<vmem>>, %arg2: memref<96x128xf32, #tpu.memory_space<vmem>>, %arg3: memref<1x128xf32, #tpu.memory_space<vmem>>, %arg4: memref<2x128xf32, #tpu.memory_space<vmem>>, %arg5: memref<2x16x96xf32, #tpu.memory_space<vmem>>) attributes {dimension_semantics = [#tpu.dimension_semantics<parallel>], iteration_bounds = array<i64: 1>, scalar_prefetch = 0 : i64, scratch_operands = 1 : i64, tpu.core_type = #tpu.core_type<tc>, window_params = [{transform_indices = @transform_0, window_bounds = array<i64: 2, 16, 32>}, {pipeline_mode = #tpu.pipeline_mode<synchronous>, transform_indices = @transform_1, window_bounds = array<i64: 96, 128>}, {pipeline_mode = #tpu.pipeline_mode<synchronous>, transform_indices = @transform_2, window_bounds = array<i64: 1, 128>}, {transform_indices = @transform_3, window_bounds = array<i64: 2, 128>}]} {
    %cst = arith.constant 0.000000e+00 : f32
    %0 = vector.broadcast %cst : f32 to vector<2x1x32xf32>
    %c0 = arith.constant 0 : index
    %c0_0 = arith.constant 0 : index
    %c0_1 = arith.constant 0 : index
    %1 = vector.load %arg5[%c0, %c0_0, %c0_1] : memref<2x16x96xf32, #tpu.memory_space<vmem>>, vector<2x1x32xf32>
    tpu.vector_store %arg5[%c0, %c0_0, %c0_1], %0 {strides = array<i32>} : memref<2x16x96xf32, #tpu.memory_space<vmem>>, vector<2x1x32xf32>,
    %c0_2 = arith.constant 0 : index
    %c0_3 = arith.constant 0 : index
    %c0_4 = arith.constant 0 : index
    %2 = vector.load %arg1[%c0_2, %c0_3, %c0_4] : memref<2x16x32xf32, #tpu.memory_space<vmem>>, vector<2x15x32xf32>
    %c0_5 = arith.constant 0 : index
    %c1 = arith.constant 1 : index
    %c0_6 = arith.constant 0 : index
    %3 = vector.load %arg5[%c0_5, %c1, %c0_6] : memref<2x16x96xf32, #tpu.memory_space<vmem>>, vector<2x15x32xf32>
    tpu.vector_store %arg5[%c0_5, %c1, %c0_6], %2 {strides = array<i32>} : memref<2x16x96xf32, #tpu.memory_space<vmem>>, vector<2x15x32xf32>,
    %c0_7 = arith.constant 0 : index
    %c0_8 = arith.constant 0 : index
    %c0_9 = arith.constant 0 : index
    %4 = vector.load %arg1[%c0_7, %c0_8, %c0_9] : memref<2x16x32xf32, #tpu.memory_space<vmem>>, vector<2x16x32xf32>
    %c0_10 = arith.constant 0 : index
    %c0_11 = arith.constant 0 : index
    %c32 = arith.constant 32 : index
    %5 = vector.load %arg5[%c0_10, %c0_11, %c32] : memref<2x16x96xf32, #tpu.memory_space<vmem>>, vector<2x16x32xf32>
    tpu.vector_store %arg5[%c0_10, %c0_11, %c32], %4 {strides = array<i32>} : memref<2x16x96xf32, #tpu.memory_space<vmem>>, vector<2x16x32xf32>,
    %cst_12 = arith.constant 0.000000e+00 : f32
    %6 = vector.broadcast %cst_12 : f32 to vector<2x1x32xf32>
    %c0_13 = arith.constant 0 : index
    %c15 = arith.constant 15 : index
    %c64 = arith.constant 64 : index
    %7 = vector.load %arg5[%c0_13, %c15, %c64] : memref<2x16x96xf32, #tpu.memory_space<vmem>>, vector<2x1x32xf32>
    tpu.vector_store %arg5[%c0_13, %c15, %c64], %6 {strides = array<i32>} : memref<2x16x96xf32, #tpu.memory_space<vmem>>, vector<2x1x32xf32>,
    %c0_14 = arith.constant 0 : index
    %c1_15 = arith.constant 1 : index
    %c0_16 = arith.constant 0 : index
    %8 = vector.load %arg1[%c0_14, %c1_15, %c0_16] : memref<2x16x32xf32, #tpu.memory_space<vmem>>, vector<2x15x32xf32>
    %c0_17 = arith.constant 0 : index
    %c0_18 = arith.constant 0 : index
    %c64_19 = arith.constant 64 : index
    %9 = vector.load %arg5[%c0_17, %c0_18, %c64_19] : memref<2x16x96xf32, #tpu.memory_space<vmem>>, vector<2x15x32xf32>
    tpu.vector_store %arg5[%c0_17, %c0_18, %c64_19], %8 {strides = array<i32>} : memref<2x16x96xf32, #tpu.memory_space<vmem>>, vector<2x15x32xf32>,
    %c0_20 = arith.constant 0 : index
    %c0_21 = arith.constant 0 : index
    %10 = vector.load %arg2[%c0_20, %c0_21] : memref<96x128xf32, #tpu.memory_space<vmem>>, vector<96x128xf32>
    %c0_22 = arith.constant 0 : index
    %c0_23 = arith.constant 0 : index
    %c0_24 = arith.constant 0 : index
    %11 = vector.load %arg5[%c0_22, %c0_23, %c0_24] : memref<2x16x96xf32, #tpu.memory_space<vmem>>, vector<2x16x96xf32>
    %12 = vector.shape_cast %11 : vector<2x16x96xf32> to vector<32x96xf32>
    %cst_25 = arith.constant dense<0.000000e+00> : vector<32x128xf32>
    %13 = tpu.matmul %12, %10, %cst_25 {dimension_numbers = #tpu.dot_dimension_numbers<[1], [0], [0], [1], [0, 0, 1, 1], [], []>} : vector<32x96xf32>, vector<96x128xf32>, vector<32x128xf32> -> vector<32x128xf32>
    %14 = vector.shape_cast %13 : vector<32x128xf32> to vector<2x16x128xf32>
    %cst_26 = arith.constant dense<0xFF800000> : vector<2x128xf32>
    %15 = vector.multi_reduction <maximumf>, %14, %cst_26 [1] : vector<2x16x128xf32> to vector<2x128xf32>
    %c0_27 = arith.constant 0 : index
    %c0_28 = arith.constant 0 : index
    %16 = vector.load %arg3[%c0_27, %c0_28] : memref<1x128xf32, #tpu.memory_space<vmem>>, vector<1x128xf32>
    %17 = vector.broadcast %16 : vector<1x128xf32> to vector<2x128xf32>
    %18 = arith.addf %15, %17 : vector<2x128xf32>
    %cst_29 = arith.constant 0.000000e+00 : f32
    %19 = vector.broadcast %cst_29 : f32 to vector<2x128xf32>
    %20 = arith.maximumf %18, %19 : vector<2x128xf32>
    %c0_30 = arith.constant 0 : index
    %c0_31 = arith.constant 0 : index
    %21 = vector.load %arg4[%c0_30, %c0_31] : memref<2x128xf32, #tpu.memory_space<vmem>>, vector<2x128xf32>
    tpu.vector_store %arg4[%c0_30, %c0_31], %20 {strides = array<i32>} : memref<2x128xf32, #tpu.memory_space<vmem>>, vector<2x128xf32>,
    return
  }
  func.func @transform_0(%arg0: i32) -> (i32, i32, i32) {
    %c0_i32 = arith.constant 0 : i32
    %c0_i32_0 = arith.constant 0 : i32
    %c0_i32_1 = arith.constant 0 : i32
    return %arg0, %c0_i32, %c0_i32_0 : i32, i32, i32
  }
  func.func @transform_1(%arg0: i32) -> (i32, i32) {
    %c0_i32 = arith.constant 0 : i32
    %c0_i32_0 = arith.constant 0 : i32
    %c0_i32_1 = arith.constant 0 : i32
    return %c0_i32, %c0_i32_0 : i32, i32
  }
  func.func @transform_2(%arg0: i32) -> (i32, i32) {
    %c0_i32 = arith.constant 0 : i32
    %c0_i32_0 = arith.constant 0 : i32
    %c0_i32_1 = arith.constant 0 : i32
    return %c0_i32, %c0_i32_0 : i32, i32
  }
  func.func @transform_3(%arg0: i32) -> (i32, i32) {
    %c0_i32 = arith.constant 0 : i32
    %c0_i32_0 = arith.constant 0 : i32
    return %arg0, %c0_i32 : i32, i32
  }
}

</mosaic_0001>

<bundles_post_ra>
// kernel: tpu_custom_call.1
= control target key start
LH: loop header
LB: loop body
LE: loop exit
PB: predicated region body
PF: predicated region fallthrough
CT: control target
= control target key end

     0   :  { %8 = vsyncpa [#allocation4], 0  ;;  %s400_s0 = inlined_call_operand.hbm [shape: f32[2,16,32], index: 0, kind: input, shape index: {}]   ;;  %s401_s1 = inlined_call_operand.hbm [shape: f32[96,128], index: 1, kind: input, shape index: {}]   ;;  %s402_s2 = inlined_call_operand.vmem [shape: f32[1,128], index: 2, kind: input, shape index: {}]   ;;  %s403_s3 = inlined_call_operand.hbm [shape: f32[2,128], index: 3, kind: output, shape index: {}]  }
   0x1   :  { %9 = vsyncpa [#allocation7], 0 }
   0x2   :  { %10 = vsyncpa [#allocation5], 0  ;;  %s15_s14 = sshll.u32 %s400_s0, 4  ;;  %s346_s15 = smov [#allocation3]   ;;  %s16_s14 = int_to_ptr.hbm [resolvable:$true] %s15_s14 }
   0x3   :  { %s17_s16 = sshll.u32 %s346_s15, 4  ;;  %s28_s19 = sshll.u32 %s401_s1, 4  ;;  %s18_s16 = int_to_ptr.vmem [resolvable:$true] %s17_s16  ;;  %s29_s19 = int_to_ptr.hbm [resolvable:$true] %s28_s19 }
   0x4   :  { %s347_s20 = smov 128   ;;  %s348_s21 = smov 8  }
   0x5   :  { %23 = dma.hbm_to_vmem [thread:$0]  %s16_s14, 512, %s18_s16, [#allocation4], %s347_s20, %s347_s20, %s348_s21  }
   0x6   :  { %s349_s22 = smov [#allocation6]  }
   0x7   :  { %s30_s23 = sshll.u32 %s349_s22, 4  ;;  %s31_s23 = int_to_ptr.vmem [resolvable:$true] %s30_s23 }
   0x8   :  { %36 = dma.hbm_to_vmem [thread:$0]  %s29_s19, 1536, %s31_s23, [#allocation7], %s347_s20, %s347_s20, %s348_s21  }
   0x9   :  { %340 = dma.done.wait [#allocation4], 512  }
   0xa   :  { %341 = vsyncadd [#allocation4], 4294966784 }
   0xb   :  { %342 = dma.done.wait [#allocation7], 1536  }
   0xc   :  { %343 = vsyncadd [#allocation7], 4294965760  ;;  %v90_v0 = vld [vmem:[#allocation3 + $0x11] sm:$0xff]  ;;  %s350_s0 = smov 64   ;;  %s351_s24 = smov 32   ;;  %v60_v2 = vld [vmem:[#allocation3] sm:$0xff] }
   0xd   :  { %v62_v1 = vld [vmem:[#allocation3 + $0x10] sm:$0xff]  ;;  %100 = vrot.lane.b32.xlu1 %v90_v0, %s350_s0  ;;  %v125_v3 = vld [vmem:[#allocation6 + $0x58] sm:$0xff]  ;;  %68 = vrot.lane.b32.xlu2 %v60_v2, %s351_s24  ;;  %v123_v5 = vld [vmem:[#allocation6 + $0x48] sm:$0xff]  ;;  %vm47_vm0 = vcmask 253952   ;;  %vm54_vm1 = vcmask 261120   ;;  %v352_v15 = vmov 0.0  }
   0xe   :  { %72 = vrot.lane.b32.xlu0 %v62_v1, %s351_s24  ;;  %224 = vmatpush.msra.mxu2 %v125_v3  ;;  %v124_v4 = vld [vmem:[#allocation6 + $0x50] sm:$0xff]  ;;  %v91_v6 = vld [vmem:[#allocation3 + $0x19] sm:$0x7f]  ;;  %v122_v8 = vld [vmem:[#allocation6 + $0x40] sm:$0xff]  ;;  %49 = vst.msk [vmem:[#allocation2 + $0x10] sm:$0x1] %vm47_vm0, %v352_v15 }
   0xf   :  { %225 = vmatpush.msra.mxu3 %v125_v3  ;;  %147 = vmatpush.msra.mxu0 %v125_v3  ;;  %v63_v7 = vld [vmem:[#allocation3 + $0x18] sm:$0xff]  ;;  %v61_v9 = vld [vmem:[#allocation3 + $0x8] sm:$0xff]  ;;  %v120_v11 = vld [vmem:[#allocation6 + $0x30] sm:$0xff]  ;;  %58 = vst.msk [vmem:[#allocation2 + $0x11] sm:$0xff] %vm54_vm1, %v62_v1  ;;  %vm56_vm2 = vcmask 260096   ;;  %vm80_vm3 = vcmask 523520  }
  0x10   :  { %227 = vmatpush.msra.mxu2 %v124_v4  ;;  %223 = vmatpush.msra.mxu1 %v125_v3  ;;  %v121_v10 = vld [vmem:[#allocation6 + $0x38] sm:$0xff]  ;;  %v119_v12 = vld [vmem:[#allocation6 + $0x28] sm:$0xff]  ;;  %v118_v16 = vld [vmem:[#allocation6 + $0x20] sm:$0xff]  ;;  %48 = vst.msk [vmem:[#allocation2] sm:$0x1] %vm47_vm0, %v352_v15  ;;  %vm85_vm4 = vcmask 778752  }
  0x11   :  { %228 = vmatpush.msra.mxu3 %v124_v4  ;;  %148 = vmatpush.msra.mxu0 %v124_v4  ;;  %v89_v13 = vld [vmem:[#allocation3 + $0x9] sm:$0x7f]  ;;  %v88_v14 = vld [vmem:[#allocation3 + $0x1] sm:$0xff]  ;;  %v117_v17 = vld [vmem:[#allocation6 + $0x18] sm:$0xff]  ;;  %55 = vst.msk [vmem:[#allocation2 + $0x1] sm:$0xff] %vm54_vm1, %v60_v2  ;;  %vm108_vm5 = vcmask 785920  }
  0x12   :  { %230 = vmatpush.msra.mxu2 %v123_v5  ;;  %226 = vmatpush.msra.mxu1 %v124_v4  ;;  %v116_v18 = vld [vmem:[#allocation6 + $0x10] sm:$0xff]  ;;  %v115_v19 = vld [vmem:[#allocation6 + $0x8] sm:$0xff]  ;;  %v53_v20 = vld [vmem:[#allocation3 + $0x18] sm:$0x7f]  ;;  %vm130_vm6 = vcmask 785408   ;;  %vm110_vm7 = vcmask 784896  }
  0x13   :  { %231 = vmatpush.msra.mxu3 %v123_v5  ;;  %149 = vmatpush.msra.mxu0 %v123_v5  ;;  %59 = vst.msk [vmem:[#allocation2 + $0x19] sm:$0x7f] %vm56_vm2, %v53_v20  ;;  %v114_v21 = vld [vmem:[#allocation6] sm:$0xff]  ;;  %v51_v23 = vld [vmem:[#allocation3 + $0x8] sm:$0x7f]  ;;  %s353_s26 = smov [#allocation8]  }
  0x14   :  { %233 = vmatpush.msra.mxu2 %v122_v8  ;;  %229 = vmatpush.msra.mxu1 %v123_v5  ;;  %57 = vst.msk [vmem:[#allocation2 + $0x9] sm:$0x7f] %vm56_vm2, %v51_v23  ;;  %v267_v50 = vld [vmem:[%s402_s2] ss:$0 sm:$0xff]  ;;  %s206_s27 = sshll.u32 %s353_s26, 4  ;;  %s208_s30 = sshll.u32 %s403_s3, 4  ;;  %s207_s27 = int_to_ptr.vmem [resolvable:$true] %s206_s27  ;;  %s209_s30 = int_to_ptr.hbm [resolvable:$true] %s208_s30 }
  0x15   :  { %102 = vrot.lane.b32.xlu1 %v91_v6, %s350_s0  ;;  %234 = vmatpush.msra.mxu3 %v122_v8  ;;  %vm197_vm8 = vcmask 1041409  }
  0x16   :  { %74 = vrot.lane.b32.xlu0 %v63_v7, %s351_s24  ;;  %70 = vrot.lane.b32.xlu2 %v61_v9, %s351_s24 }
  0x17   :  { %236 = vmatpush.msra.mxu2 %v121_v10  ;;  %237 = vmatpush.msra.mxu3 %v121_v10 }
  0x18   :  { %150 = vmatpush.msra.mxu0 %v122_v8  ;;  %232 = vmatpush.msra.mxu1 %v122_v8 }
  0x19   :  { %239 = vmatpush.msra.mxu2 %v120_v11  ;;  %240 = vmatpush.msra.mxu3 %v120_v11 }
  0x1a   :  { %151 = vmatpush.msra.mxu0 %v121_v10  ;;  %235 = vmatpush.msra.mxu1 %v121_v10 }
  0x1b   :  { %242 = vmatpush.msra.mxu2 %v119_v12  ;;  %243 = vmatpush.msra.mxu3 %v119_v12 }
  0x1c   :  { %152 = vmatpush.msra.mxu0 %v120_v11  ;;  %238 = vmatpush.msra.mxu1 %v120_v11 }
  0x1d   :  { %98 = vrot.lane.b32.xlu1 %v89_v13, %s350_s0  ;;  %245 = vmatpush.msra.mxu2 %v118_v16 }
  0x1e   :  { %96 = vrot.lane.b32.xlu0 %v88_v14, %s350_s0  ;;  %153 = vmatpush.msra.mxu0 %v119_v12 }
  0x1f   :  { %241 = vmatpush.msra.mxu1 %v119_v12  ;;  %246 = vmatpush.msra.mxu3 %v118_v16 }
  0x20   :  { %154 = vmatpush.msra.mxu0 %v118_v16  ;;  %248 = vmatpush.msra.mxu2 %v117_v17 }
  0x21   :  { %244 = vmatpush.msra.mxu1 %v118_v16  ;;  %249 = vmatpush.msra.mxu3 %v117_v17 }
  0x22   :  { %155 = vmatpush.msra.mxu0 %v117_v17  ;;  %251 = vmatpush.msra.mxu2 %v116_v18 }
  0x23   :  { %247 = vmatpush.msra.mxu1 %v117_v17  ;;  %252 = vmatpush.msra.mxu3 %v116_v18 }
  0x24   :  { %156 = vmatpush.msra.mxu0 %v116_v18  ;;  %254 = vmatpush.msra.mxu2 %v115_v19 }
  0x25   :  { %250 = vmatpush.msra.mxu1 %v116_v18  ;;  %255 = vmatpush.msra.mxu3 %v115_v19 }
  0x26   :  { %157 = vmatpush.msra.mxu0 %v115_v19  ;;  %257 = vmatpush.msra.mxu2 %v114_v21 }
  0x27   :  { %253 = vmatpush.msra.mxu1 %v115_v19  ;;  %258 = vmatpush.msra.mxu3 %v114_v21 }
  0x28   :  { %158 = vmatpush.msra.mxu0 %v114_v21 }
  0x29   :  { %256 = vmatpush.msra.mxu1 %v114_v21 }
  0x67   :  { %v69_v22 = vpop.permute.xlu2 %68 }
  0x68   :  { %81 = vst.msk [vmem:[#allocation2] sm:$0xff] %vm80_vm3, %v69_v22 }
  0x70   :  { %v71_v24 = vpop.permute.xlu2 %70 }
  0x71   :  { %82 = vst.msk [vmem:[#allocation2 + $0x8] sm:$0xff] %vm80_vm3, %v71_v24 }
  0x72   :  { %86 = vst.msk [vmem:[#allocation2 + $0xf] sm:$0x1] %vm85_vm4, %v352_v15 }
  0x7f   :  { %v101_v25 = vpop.permute.xlu1 %100 }
  0x80   :  { %v73_v26 = vpop.permute.xlu0 %72 }
  0x81   :  { %83 = vst.msk [vmem:[#allocation2 + $0x10] sm:$0xff] %vm80_vm3, %v73_v26 }
  0x82   :  { %112 = vst.msk [vmem:[#allocation2 + $0x10] sm:$0xff] %vm108_vm5, %v101_v25 }
  0x87   :  { %v103_v27 = vpop.permute.xlu1 %102 }
  0x88   :  { %v75_v28 = vpop.permute.xlu0 %74 }
  0x89   :  { %84 = vst.msk [vmem:[#allocation2 + $0x18] sm:$0xff] %vm80_vm3, %v75_v28  ;;  %v128_v29 = vld [vmem:[#allocation2 + $0x10] sm:$0xff] }
  0x8a   :  { %87 = vst.msk [vmem:[#allocation2 + $0x1f] sm:$0x1] %vm85_vm4, %v352_v15  ;;  %221 = vmatmul.msk.f32.vlgmr.msra.gmra.mxu2 %vm130_vm6, %v128_v29 }
  0x8b   :  { %113 = vst.msk [vmem:[#allocation2 + $0x18] sm:$0x7f] %vm110_vm7, %v103_v27 }
  0x8f   :  { %v99_v30 = vpop.permute.xlu1 %98 }
  0x90   :  { %v97_v31 = vpop.permute.xlu0 %96  ;;  %111 = vst.msk [vmem:[#allocation2 + $0x8] sm:$0x7f] %vm110_vm7, %v99_v30 }
  0x91   :  { %109 = vst.msk [vmem:[#allocation2] sm:$0xff] %vm108_vm5, %v97_v31 }
  0x92   :  { %v129_v32 = vld [vmem:[#allocation2 + $0x18] sm:$0xff] }
  0x93   :  { %222 = vmatmul.msk.f32.vlgmr.msra.gmra.mxu3 %vm130_vm6, %v129_v32 }
  0x97   :  { %v127_v33 = vld [vmem:[#allocation2 + $0x8] sm:$0xff] }
  0x98   :  { %v126_v34 = vld [vmem:[#allocation2] sm:$0xff]  ;;  %220 = vmatmul.msk.f32.vlgmr.msra.gmra.mxu1 %vm130_vm6, %v127_v33 }
  0x99   :  { %219 = vmatmul.msk.f32.vlgmr.msra.gmra.mxu0 %vm130_vm6, %v126_v34 }
 0x10d   :  { %v166_v35 = vpop.f32.mrf.mxu2 }
 0x115   :  { %v163_v37 = vpop.f32.mrf.mxu1 }
 0x116   :  { %v169_v36 = vpop.f32.mrf.mxu3  ;;  %v160_v39 = vpop.f32.mrf.mxu0 }
 0x117   :  { %v179_v38 = vmax.f32 %v166_v35, %v169_v36  ;;  %v172_v40 = vmax.f32 %v160_v39, %v163_v37 }
 0x119   :  { %v180_v41 = vrot.slane %v179_v38, 4  ;;  %v173_v42 = vrot.slane %v172_v40, 4 }
 0x11b   :  { %v181_v43 = vmax.f32 %v179_v38, %v180_v41  ;;  %v174_v44 = vmax.f32 %v172_v40, %v173_v42 }
 0x11d   :  { %v182_v45 = vrot.slane %v181_v43, 2  ;;  %v175_v46 = vrot.slane %v174_v44, 2 }
 0x11f   :  { %v183_v47 = vmax.f32 %v181_v43, %v182_v45  ;;  %v176_v48 = vmax.f32 %v174_v44, %v175_v46 }
 0x121   :  { %v184_v49 = vrot.slane %v183_v47, 1  ;;  %v177_v51 = vrot.slane %v176_v48, 1 }
 0x123   :  { %v185_v52 = vmax.f32 %v183_v47, %v184_v49  ;;  %v178_v53 = vmax.f32 %v176_v48, %v177_v51 }
 0x125   :  { %v191_v54 = vadd.f32 %v267_v50, %v185_v52  ;;  %v190_v55 = vadd.f32 %v267_v50, %v178_v53 }
 0x127   :  { %v193_v56 = vmax.f32 %v191_v54, 0.0  ;;  %v192_v57 = vmax.f32 %v190_v55, 0.0 }
 0x129   :  { %v196_v58 = vrot.slane %v193_v56, 7 }
 0x12b   :  { %v198_v59 = vsel %vm197_vm8, %v196_v58, %v192_v57 }
 0x12c   :  { %200 = vst [vmem:[#allocation8] sm:$0x3] %v198_v59 }
 0x12d   :  { %211 = dma.vmem_to_hbm [thread:$0]  %s207_s27, 32, %s209_s30, [#allocation5]  }
 0x12e   :  { %344 = dma.done.wait [#allocation5], 32  }
 0x12f   :  { %345 = vsyncadd [#allocation5], 4294967264 }
 0x130   :  { %216 = vsyncpa [#allocation4], 1 }
 0x131   :  { %217 = vsyncpa [#allocation7], 1 }
 0x132   :  { %218 = vsyncpa [#allocation5], 1 }

</bundles_post_ra>
